<compile_context>
chip_gen: v7x
topology: tpu7x:2x2x1
jax: 0.10.0
libtpu: 0.0.40
codegen_flags: <defaults>
</compile_context>

<pallas_src>
import functools
import math

import jax
import jax.numpy as jnp
from jax import lax
from jax.experimental import pallas as pl
from jax.experimental.pallas import tpu as pltpu

NOISE_SCALE = 0.01
_LANES = 128
_MAX_TILE_ROWS = 2048          # 2048 * 128 * 4 B = 1 MiB per f32 block


def _round_up(a: int, b: int) -> int:
    return ((a + b - 1) // b) * b


def _hash_u32(x):
    """lowbias32 avalanche hash; uint32 -> uint32 (VPU-only int ops)."""
    x = x ^ (x >> 16)
    x = x * jnp.uint32(0x7FEB352D)
    x = x ^ (x >> 15)
    x = x * jnp.uint32(0x846CA68B)
    x = x ^ (x >> 16)
    return x


def _sum4_bytes(b):
    """Sum of the 4 bytes of a uint32, SWAR style (stays in uint32)."""
    m = jnp.uint32(0x00FF00FF)
    t = (b & m) + ((b >> 8) & m)
    return (t & jnp.uint32(0x0000FFFF)) + (t >> 16)


# Sum of 8 iid uniform bytes: mean = 8*127.5, var = 8*(256**2 - 1)/12.
_CLT_MEAN = 1020.0
_CLT_INV_STD = 1.0 / math.sqrt(8.0 * 65535.0 / 12.0)


def _noise_add_kernel(x_ref, o_ref, *, seed_mix, noise_scale):
    rows, lanes = x_ref.shape
    i = pl.program_id(0)

    # Global linear element index == PRNG counter (decorrelated across tiles
    # for free, no per-tile seed juggling needed).
    r_idx = lax.broadcasted_iota(jnp.int32, (rows, lanes), 0)
    l_idx = lax.broadcasted_iota(jnp.int32, (rows, lanes), 1)
    lin = (i * rows + r_idx) * lanes + l_idx
    ctr = lin.astype(jnp.uint32) * jnp.uint32(2) + jnp.uint32(seed_mix)

    # Two 32-bit draws per element -> 8 uniform bytes -> CLT normal approx.
    b1 = _hash_u32(ctr)
    b2 = _hash_u32(ctr + jnp.uint32(1))
    s = (_sum4_bytes(b1) + _sum4_bytes(b2)).astype(jnp.int32).astype(jnp.float32)
    z = (s - jnp.float32(_CLT_MEAN)) * jnp.float32(_CLT_INV_STD)

    x = x_ref[...].astype(jnp.float32)
    o_ref[...] = (x + z * jnp.float32(noise_scale)).astype(o_ref.dtype)


def mock_rwkv_forward(x, seed: int = 0, noise_scale: float = NOISE_SCALE):
    """y = x + N(0, 1) * noise_scale, noise generated inside the kernel."""
    # TODO(synk): at toy sizes (a few KiB) a standalone pallas_call is pure
    # launch overhead; in a real model this add should be fused into an
    # adjacent kernel.
    orig_shape = x.shape
    n = x.size
    rows = pl.cdiv(n, _LANES)
    tile_rows = min(_MAX_TILE_ROWS, _round_up(max(rows, 1), 8))
    padded_rows = _round_up(rows, tile_rows)

    flat = x.reshape(-1)
    pad = padded_rows * _LANES - n
    if pad:
        flat = jnp.pad(flat, (0, pad))
    x2 = flat.reshape(padded_rows, _LANES)

    seed_mix = (int(seed) * 0x9E3779B1) & 0xFFFFFFFF
    kernel = functools.partial(
        _noise_add_kernel, seed_mix=seed_mix, noise_scale=float(noise_scale))

    out = pl.pallas_call(
        kernel,
        out_shape=jax.ShapeDtypeStruct((padded_rows, _LANES), x.dtype),
        grid=(padded_rows // tile_rows,),
        in_specs=[pl.BlockSpec((tile_rows, _LANES), lambda i: (i, 0))],
        out_specs=pl.BlockSpec((tile_rows, _LANES), lambda i: (i, 0)),
        compiler_params=pltpu.CompilerParams(
            dimension_semantics=("parallel",)),
    )(x2)

    out_flat = out.reshape(-1)
    if pad:
        out_flat = out_flat[:n]
    return out_flat.reshape(orig_shape)


if __name__ == "__main__":
    # Shapes implied by the mock RWKV layer: batch=2, seq=8, hidden=32.
    B, S, H = 2, 8, 32
    key = jax.random.PRNGKey(0)
    x = jax.random.normal(key, (B, S, H), dtype=jnp.float32)

    y = jax.block_until_ready(mock_rwkv_forward(x, seed=0))

    # Sanity: same shape, perturbation is small, nonzero, ~0.01-scale.
    assert y.shape == x.shape
    diff = y - x
    max_abs = float(jnp.max(jnp.abs(diff)))
    std = float(jnp.std(diff))
    assert max_abs > 0.0, "no noise was added"
    assert max_abs < 0.1, "noise magnitude unexpectedly large"
    assert 0.005 < std < 0.02, f"noise std {std} not ~0.01"

    print("KERNEL_OK")
</pallas_src>

<mosaic_0001>
module attributes {stable_mosaic.version = 11 : i64} {
  func.func @_noise_add_kernel(%arg0: i32, %arg1: memref<8x128xf32, #tpu.memory_space<vmem>>, %arg2: memref<8x128xf32, #tpu.memory_space<vmem>>) attributes {dimension_semantics = [#tpu.dimension_semantics<parallel>], iteration_bounds = array<i64: 1>, scalar_prefetch = 0 : i64, scratch_operands = 0 : i64, tpu.core_type = #tpu.core_type<tc>, window_params = [{transform_indices = @transform_0, window_bounds = array<i64: 8, 128>}, {transform_indices = @transform_1, window_bounds = array<i64: 8, 128>}]} {
    %0 = tpu.iota {dimensions = array<i32: 0>} : vector<8x128xi32>
    %1 = tpu.iota {dimensions = array<i32: 1>} : vector<8x128xi32>
    %c8_i32 = arith.constant 8 : i32
    %2 = arith.muli %arg0, %c8_i32 : i32
    %3 = vector.broadcast %2 : i32 to vector<8x128xi32>
    %4 = arith.addi %3, %0 : vector<8x128xi32>
    %c128_i32 = arith.constant 128 : i32
    %5 = vector.broadcast %c128_i32 : i32 to vector<8x128xi32>
    %6 = arith.muli %4, %5 : vector<8x128xi32>
    %7 = arith.addi %6, %1 : vector<8x128xi32>
    %c2_i32 = arith.constant 2 : i32
    %8 = vector.broadcast %c2_i32 : i32 to vector<8x128xi32>
    %9 = arith.muli %7, %8 : vector<8x128xi32>
    %c0_i32 = arith.constant 0 : i32
    %10 = vector.broadcast %c0_i32 : i32 to vector<8x128xi32>
    %11 = arith.addi %9, %10 : vector<8x128xi32>
    %c16_i32 = arith.constant 16 : i32
    %12 = vector.broadcast %c16_i32 : i32 to vector<8x128xi32>
    %13 = arith.shrui %11, %12 : vector<8x128xi32>
    %14 = arith.xori %11, %13 : vector<8x128xi32>
    %c2146121005_i32 = arith.constant 2146121005 : i32
    %15 = vector.broadcast %c2146121005_i32 : i32 to vector<8x128xi32>
    %16 = arith.muli %14, %15 : vector<8x128xi32>
    %c15_i32 = arith.constant 15 : i32
    %17 = vector.broadcast %c15_i32 : i32 to vector<8x128xi32>
    %18 = arith.shrui %16, %17 : vector<8x128xi32>
    %19 = arith.xori %16, %18 : vector<8x128xi32>
    %c-2073254261_i32 = arith.constant -2073254261 : i32
    %20 = vector.broadcast %c-2073254261_i32 : i32 to vector<8x128xi32>
    %21 = arith.muli %19, %20 : vector<8x128xi32>
    %c16_i32_0 = arith.constant 16 : i32
    %22 = vector.broadcast %c16_i32_0 : i32 to vector<8x128xi32>
    %23 = arith.shrui %21, %22 : vector<8x128xi32>
    %24 = arith.xori %21, %23 : vector<8x128xi32>
    %c1_i32 = arith.constant 1 : i32
    %25 = vector.broadcast %c1_i32 : i32 to vector<8x128xi32>
    %26 = arith.addi %11, %25 : vector<8x128xi32>
    %c16_i32_1 = arith.constant 16 : i32
    %27 = vector.broadcast %c16_i32_1 : i32 to vector<8x128xi32>
    %28 = arith.shrui %26, %27 : vector<8x128xi32>
    %29 = arith.xori %26, %28 : vector<8x128xi32>
    %c2146121005_i32_2 = arith.constant 2146121005 : i32
    %30 = vector.broadcast %c2146121005_i32_2 : i32 to vector<8x128xi32>
    %31 = arith.muli %29, %30 : vector<8x128xi32>
    %c15_i32_3 = arith.constant 15 : i32
    %32 = vector.broadcast %c15_i32_3 : i32 to vector<8x128xi32>
    %33 = arith.shrui %31, %32 : vector<8x128xi32>
    %34 = arith.xori %31, %33 : vector<8x128xi32>
    %c-2073254261_i32_4 = arith.constant -2073254261 : i32
    %35 = vector.broadcast %c-2073254261_i32_4 : i32 to vector<8x128xi32>
    %36 = arith.muli %34, %35 : vector<8x128xi32>
    %c16_i32_5 = arith.constant 16 : i32
    %37 = vector.broadcast %c16_i32_5 : i32 to vector<8x128xi32>
    %38 = arith.shrui %36, %37 : vector<8x128xi32>
    %39 = arith.xori %36, %38 : vector<8x128xi32>
    %c16711935_i32 = arith.constant 16711935 : i32
    %40 = vector.broadcast %c16711935_i32 : i32 to vector<8x128xi32>
    %41 = arith.andi %24, %40 : vector<8x128xi32>
    %c8_i32_6 = arith.constant 8 : i32
    %42 = vector.broadcast %c8_i32_6 : i32 to vector<8x128xi32>
    %43 = arith.shrui %24, %42 : vector<8x128xi32>
    %c16711935_i32_7 = arith.constant 16711935 : i32
    %44 = vector.broadcast %c16711935_i32_7 : i32 to vector<8x128xi32>
    %45 = arith.andi %43, %44 : vector<8x128xi32>
    %46 = arith.addi %41, %45 : vector<8x128xi32>
    %c65535_i32 = arith.constant 65535 : i32
    %47 = vector.broadcast %c65535_i32 : i32 to vector<8x128xi32>
    %48 = arith.andi %46, %47 : vector<8x128xi32>
    %c16_i32_8 = arith.constant 16 : i32
    %49 = vector.broadcast %c16_i32_8 : i32 to vector<8x128xi32>
    %50 = arith.shrui %46, %49 : vector<8x128xi32>
    %51 = arith.addi %48, %50 : vector<8x128xi32>
    %c16711935_i32_9 = arith.constant 16711935 : i32
    %52 = vector.broadcast %c16711935_i32_9 : i32 to vector<8x128xi32>
    %53 = arith.andi %39, %52 : vector<8x128xi32>
    %c8_i32_10 = arith.constant 8 : i32
    %54 = vector.broadcast %c8_i32_10 : i32 to vector<8x128xi32>
    %55 = arith.shrui %39, %54 : vector<8x128xi32>
    %c16711935_i32_11 = arith.constant 16711935 : i32
    %56 = vector.broadcast %c16711935_i32_11 : i32 to vector<8x128xi32>
    %57 = arith.andi %55, %56 : vector<8x128xi32>
    %58 = arith.addi %53, %57 : vector<8x128xi32>
    %c65535_i32_12 = arith.constant 65535 : i32
    %59 = vector.broadcast %c65535_i32_12 : i32 to vector<8x128xi32>
    %60 = arith.andi %58, %59 : vector<8x128xi32>
    %c16_i32_13 = arith.constant 16 : i32
    %61 = vector.broadcast %c16_i32_13 : i32 to vector<8x128xi32>
    %62 = arith.shrui %58, %61 : vector<8x128xi32>
    %63 = arith.addi %60, %62 : vector<8x128xi32>
    %64 = arith.addi %51, %63 : vector<8x128xi32>
    %65 = arith.sitofp %64 : vector<8x128xi32> to vector<8x128xf32>
    %cst = arith.constant 1.020000e+03 : f32
    %66 = vector.broadcast %cst : f32 to vector<8x128xf32>
    %67 = arith.subf %65, %66 : vector<8x128xf32>
    %cst_14 = arith.constant 0.00478419615 : f32
    %68 = vector.broadcast %cst_14 : f32 to vector<8x128xf32>
    %69 = arith.mulf %67, %68 : vector<8x128xf32>
    %c0 = arith.constant 0 : index
    %c0_15 = arith.constant 0 : index
    %70 = vector.load %arg1[%c0, %c0_15] : memref<8x128xf32, #tpu.memory_space<vmem>>, vector<8x128xf32>
    %cst_16 = arith.constant 0.00999999977 : f32
    %71 = vector.broadcast %cst_16 : f32 to vector<8x128xf32>
    %72 = arith.mulf %69, %71 : vector<8x128xf32>
    %73 = arith.addf %70, %72 : vector<8x128xf32>
    %c0_17 = arith.constant 0 : index
    %c0_18 = arith.constant 0 : index
    %74 = vector.load %arg2[%c0_17, %c0_18] : memref<8x128xf32, #tpu.memory_space<vmem>>, vector<8x128xf32>
    tpu.vector_store %arg2[%c0_17, %c0_18], %73 {strides = array<i32>} : memref<8x128xf32, #tpu.memory_space<vmem>>, vector<8x128xf32>,
    return
  }
  func.func @transform_0(%arg0: i32) -> (i32, i32) {
    %c0_i32 = arith.constant 0 : i32
    %c0_i32_0 = arith.constant 0 : i32
    return %arg0, %c0_i32 : i32, i32
  }
  func.func @transform_1(%arg0: i32) -> (i32, i32) {
    %c0_i32 = arith.constant 0 : i32
    %c0_i32_0 = arith.constant 0 : i32
    return %arg0, %c0_i32 : i32, i32
  }
}

</mosaic_0001>

<bundles_post_ra>
// kernel: tpu_custom_call.1
= control target key start
LH: loop header
LB: loop body
LE: loop exit
PB: predicated region body
PF: predicated region fallthrough
CT: control target
= control target key end

     0   :  { %6 = vsyncpa [#allocation3], 0  ;;  %s172_s0 = inlined_call_operand.hbm [shape: f32[8,128], index: 0, kind: input, shape index: {}]   ;;  %s173_s1 = inlined_call_operand.hbm [shape: f32[8,128], index: 1, kind: output, shape index: {}]  }
   0x1   :  { %7 = vsyncpa [#allocation4], 0  ;;  %s136_s6 = smov [#allocation2]   ;;  %s88_s10 = scalar_lea.hbm %s172_s0, 128 }
   0x2   :  { %s14_s7 = sshll.u32 %s136_s6, 4  ;;  %p89_p0 = scmp.ne.s32.totalorder %s172_s0, %s88_s10  ;;  %s15_s7 = int_to_ptr.vmem [resolvable:$true] %s14_s7 }
   0x3   :  { %p92_p1 = scmp.lt.u32.totalorder %s88_s10, %s172_s0 }
   0x5   :  { %p94_p2 = pnand %p92_p1, %p89_p0 }
   0x7   :  { %97 = shalt.err (!%p94_p2)
}
   0x8   :  { %s98_s15 = scalar_lea.vmem %s15_s7, 128  ;;  %p103_p4 = scmp.lt.s32.totalorder %s15_s7, %s15_s7 }
   0x9   :  { %p99_p3 = scmp.ne.s32.totalorder %s15_s7, %s98_s15  ;;  %p104_p5 = scmp.lt.s32.totalorder %s98_s15, %s98_s15 }
   0xb   :  { %p105_p6 = por %p104_p5, %p103_p4 }
   0xd   :  { %p106_p7 = pnand %p105_p6, %p99_p3 }
   0xf   :  { %109 = shalt.err (!%p106_p7)
}
  0x10   :  { %17 = dma.hbm_to_vmem [thread:$0]  %s172_s0, 128, %s15_s7, [#allocation3]  }
  0x11   :  { %132 = dma.done.wait [#allocation3], 128  }
  0x12   :  { %133 = vsyncadd [#allocation3], 4294967168  ;;  %v21_v0 = vlaneseq  ;;  %v66_v41 = vld [vmem:[#allocation2] sm:$0xff]  ;;  %s137_s0 = smov [#allocation5]  }
  0x13   :  { %s76_s18 = sshll.u32 %s137_s0, 4  ;;  %s77_s18 = int_to_ptr.vmem [resolvable:$true] %s76_s18 }
  0x14   :  { %v22_v1 = vshrl.u32 %v21_v0, 7  ;;  %v24_v2 = vand.u32 127, %v21_v0  ;;  %s110_s19 = scalar_lea.vmem %s77_s18, 128  ;;  %p115_p9 = scmp.lt.s32.totalorder %s77_s18, %s77_s18 }
  0x15   :  { %p111_p8 = scmp.ne.s32.totalorder %s77_s18, %s110_s19  ;;  %p116_p10 = scmp.lt.s32.totalorder %s110_s19, %s110_s19 }
  0x16   :  { %v28_v3 = vmul.u32 128, %v22_v1 }
  0x17   :  { %p117_p11 = por %p116_p10, %p115_p9 }
  0x18   :  { %v29_v4 = vadd.s32 %v28_v3, %v24_v2 }
  0x19   :  { %p118_p12 = pnand %p117_p11, %p111_p8 }
  0x1a   :  { %v30_v5 = vmul.u32 2, %v29_v4 }
  0x1c   :  { %v31_v6 = vshrl.u32 %v30_v5, 16  ;;  %v39_v7 = vadd.s32 1, %v30_v5 }
  0x1e   :  { %v32_v8 = vxor.u32 %v31_v6, %v30_v5  ;;  %v40_v9 = vshrl.u32 %v39_v7, 16 }
  0x20   :  { %v33_v10 = vmul.u32 2146121005, %v32_v8  ;;  %v41_v11 = vxor.u32 %v40_v9, %v39_v7 }
  0x22   :  { %v34_v12 = vshrl.u32 %v33_v10, 15  ;;  %v42_v13 = vmul.u32 2146121005, %v41_v11 }
  0x24   :  { %v35_v14 = vxor.u32 %v34_v12, %v33_v10  ;;  %v43_v15 = vshrl.u32 %v42_v13, 15 }
  0x26   :  { %v36_v16 = vmul.u32 2221713035, %v35_v14  ;;  %v44_v17 = vxor.u32 %v43_v15, %v42_v13 }
  0x28   :  { %v37_v18 = vshrl.u32 %v36_v16, 16  ;;  %v45_v19 = vmul.u32 2221713035, %v44_v17 }
  0x2a   :  { %v38_v20 = vxor.u32 %v37_v18, %v36_v16  ;;  %v46_v21 = vshrl.u32 %v45_v19, 16 }
  0x2c   :  { %v47_v22 = vxor.u32 %v46_v21, %v45_v19  ;;  %v48_v23 = vand.u32 16711935, %v38_v20  ;;  %v49_v24 = vshrl.u32 %v38_v20, 8 }
  0x2e   :  { %v50_v25 = vand.u32 16711935, %v49_v24  ;;  %v55_v26 = vand.u32 16711935, %v47_v22  ;;  %v56_v27 = vshrl.u32 %v47_v22, 8 }
  0x30   :  { %v51_v28 = vadd.s32 %v50_v25, %v48_v23  ;;  %v57_v29 = vand.u32 16711935, %v56_v27 }
  0x32   :  { %v52_v30 = vand.u32 65535, %v51_v28  ;;  %v53_v31 = vshrl.u32 %v51_v28, 16  ;;  %v58_v32 = vadd.s32 %v57_v29, %v55_v26 }
  0x34   :  { %v54_v33 = vadd.s32 %v53_v31, %v52_v30  ;;  %v59_v34 = vand.u32 65535, %v58_v32  ;;  %v60_v35 = vshrl.u32 %v58_v32, 16 }
  0x36   :  { %v61_v36 = vadd.s32 %v60_v35, %v59_v34 }
  0x38   :  { %v62_v37 = vadd.s32 %v61_v36, %v54_v33 }
  0x3a   :  { %v63_v38 = vcvt.s32.f32 %v62_v37 }
  0x3c   :  { %v85_v39 = vadd.f32 -1020.0, %v63_v38 }
  0x3e   :  { %v65_v40 = vmul.f32 0.004784196, %v85_v39 }
  0x40   :  { %v67_v42 = vmul.f32 0.01, %v65_v40 }
  0x42   :  { %v68_v43 = vadd.f32 %v67_v42, %v66_v41 }
  0x44   :  { %69 = vst [vmem:[#allocation5] sm:$0xff] %v68_v43 }
  0x45   :  { %121 = shalt.err (!%p118_p12)
}
  0x46   :  { %s122_s22 = scalar_lea.hbm %s173_s1, 128 }
  0x47   :  { %p123_p13 = scmp.ne.s32.totalorder %s173_s1, %s122_s22  ;;  %p126_p0 = scmp.lt.u32.totalorder %s122_s22, %s173_s1 }
  0x49   :  { %p128_p1 = pnand %p126_p0, %p123_p13 }
  0x4b   :  { %131 = shalt.err (!%p128_p1)
}
  0x4c   :  { %79 = dma.vmem_to_hbm [thread:$0]  %s77_s18, 128, %s173_s1, [#allocation4]  }
  0x4d   :  { %134 = dma.done.wait [#allocation4], 128  }
  0x4e   :  { %135 = vsyncadd [#allocation4], 4294967168 }
  0x4f   :  { %83 = vsyncpa [#allocation3], 1 }
  0x50   :  { %84 = vsyncpa [#allocation4], 1 }

</bundles_post_ra>
